<compile_context>
chip_gen: v7x
topology: tpu7x:2x2x1
jax: 0.10.0
libtpu: 0.0.40
codegen_flags: <defaults>
</compile_context>

<pallas_src>
import functools
import math

import jax
import jax.numpy as jnp
import numpy as np
from jax.experimental import pallas as pl
from jax.experimental.pallas import tpu as pltpu

ALMOSTZERO = 0.0001
_HEAD_ROWS = 8  # padded/reordered head rows: [mu0, mu1, s11, 0, s21, s22, 0, 0]


def _softplus(x):
    # matches torch.nn.functional.softplus (beta=1, threshold=20)
    return jnp.where(x > 20.0, x, jnp.log1p(jnp.exp(jnp.minimum(x, 20.0))))


def _round_up(x, m):
    return ((x + m - 1) // m) * m


def _mlp_head_kernel(*refs, num_layers):
    """One lane-dense tile: x (F, TN) -> out (8, TN).

    refs = (x_ref, wt0, b0, ..., wt_{L-1}, b_{L-1}, out_ref)
    Weights are pre-transposed to (out, in); the head layer is pre-padded /
    row-reordered so the MXU directly produces
    rows [mu0, mu1, s11_raw, 0, s21, s22_raw, 0, 0].
    """
    x_ref = refs[0]
    param_refs = refs[1:1 + 2 * num_layers]
    out_ref = refs[-1]

    h = x_ref[...]                                      # (F, TN), N on lanes
    for i in range(num_layers):
        wt = param_refs[2 * i][...]                     # (out, in), resident
        b = param_refs[2 * i + 1][...]                  # (out, 1) -> lane bcast
        h = jnp.dot(wt, h, preferred_element_type=jnp.float32) + b
        if i < num_layers - 1:
            h = jnp.maximum(h, 0.0)                     # ReLU on hidden layers

    # Whole-tile masked softplus on the Cholesky-diagonal rows (2 and 5):
    # keeps exp/log1p on the EUP slot, no narrow lane slices, no concat,
    # single wide unmasked store.
    row = jax.lax.broadcasted_iota(jnp.int32, h.shape, 0)
    out_ref[...] = jnp.where((row == 2) | (row == 5), _softplus(h), h)


def rnn_cell_forward(inp, params, eps_identity=ALMOSTZERO, *,
                     tile_n=512, matmul_dtype=jnp.float32):
    """
    inp:    (B, S, no_input) float32
    params: list of (W, b); W: (in_features, out_features), b: (out_features,)
    returns (mu, sigma_chol): mu (B, S, 2), sigma_chol (B, 2*S, 2)

    matmul_dtype: set to jnp.bfloat16 on v6e/v7x to halve HBM traffic for the
    matmul operands (accumulation stays f32); keep f32 on v5e.
    """
    del eps_identity  # unused in the reference forward (kept for API parity)
    B, S, F = inp.shape
    N = B * S
    num_layers = len(params)

    # ---- layout flip: put the big N axis on lanes (last dim) ---------------
    xT = jnp.transpose(inp.reshape(N, F)).astype(matmul_dtype)      # (F, N)
    TN = min(int(tile_n), _round_up(N, 128))                        # lane tile
    num_tiles = pl.cdiv(N, TN)
    n_pad = num_tiles * TN
    if n_pad != N:
        xT = jnp.pad(xT, ((0, 0), (0, n_pad - N)))

    # ---- weights: transpose to (out, in); pad/reorder the head layer -------
    flat_params = []
    for li, (W, b) in enumerate(params):
        Wt = jnp.asarray(W, jnp.float32).T                          # (out, in)
        bc = jnp.asarray(b, jnp.float32).reshape(-1, 1)             # (out, 1)
        if li == num_layers - 1:
            in_dim = Wt.shape[1]
            zw = jnp.zeros((1, in_dim), jnp.float32)
            zb = jnp.zeros((1, 1), jnp.float32)
            # rows -> [mu0, mu1, s11, <0>, s21, s22, <0>, <0>]
            Wt = jnp.concatenate([Wt[0:3], zw, Wt[3:5], zw, zw], axis=0)
            bc = jnp.concatenate([bc[0:3], zb, bc[3:5], zb, zb], axis=0)
        flat_params.append(Wt.astype(matmul_dtype))
        flat_params.append(bc)                                      # bias stays f32

    # ---- 1-D grid over N; weights resident via constant index_map ----------
    in_specs = [pl.BlockSpec((F, TN), lambda i: (0, i))]
    for p in flat_params:
        in_specs.append(pl.BlockSpec(p.shape, lambda i: (0, 0)))
    out_specs = pl.BlockSpec((_HEAD_ROWS, TN), lambda i: (0, i))

    kernel = functools.partial(_mlp_head_kernel, num_layers=num_layers)
    out = pl.pallas_call(
        kernel,
        out_shape=jax.ShapeDtypeStruct((_HEAD_ROWS, n_pad), jnp.float32),
        grid=(num_tiles,),
        in_specs=in_specs,
        out_specs=out_specs,
        compiler_params=pltpu.CompilerParams(
            dimension_semantics=("parallel",)),   # lets v7x shard tiles on 2 TCs
    )(xT, *flat_params)

    # ---- cheap XLA glue back to the reference layout ------------------------
    out = out[:, :N].T.reshape(B, S, _HEAD_ROWS)         # (B, S, 8)
    mu = out[:, :, 0:2]
    # rows [2:4] = [s11, 0], rows [4:6] = [s21, s22]  ->  (B, 2*S, 2)
    sigma_chol = jnp.concatenate([out[:, :, 2:4], out[:, :, 4:6]], axis=1)
    return mu, sigma_chol


def _reference(inp, params):
    """Pure-JAX reference matching the torch forward."""
    h = inp
    for i, (W, b) in enumerate(params):
        h = jnp.einsum("bsf,fo->bso", h, W) + b
        if i < len(params) - 1:
            h = jnp.maximum(h, 0.0)
    mu = h[..., 0:2]
    s11 = _softplus(h[..., 2:3])
    s21 = h[..., 3:4]
    s22 = _softplus(h[..., 4:5])
    zeros = jnp.zeros_like(s11)
    sigma_chol = jnp.concatenate(
        [jnp.concatenate([s11, zeros], axis=2),
         jnp.concatenate([s21, s22], axis=2)], axis=1)
    return mu, sigma_chol


if __name__ == "__main__":
    network_params = {"hidden_layer_width": 32, "num_hidden_layers": 2}
    no_input = 4

    H = network_params["hidden_layer_width"]
    # Linear(no_input, H), [Linear(H, H)] * (num_hidden_layers - 1), Linear(H, 5)
    dims = [no_input] + [H] * network_params["num_hidden_layers"] + [5]

    key = jax.random.PRNGKey(0)
    params = []
    for i in range(len(dims) - 1):
        key, kw, kb = jax.random.split(key, 3)
        bound = 1.0 / math.sqrt(dims[i])        # same scale as nn.Linear default init
        W = jax.random.uniform(kw, (dims[i], dims[i + 1]), jnp.float32, -bound, bound)
        b = jax.random.uniform(kb, (dims[i + 1],), jnp.float32, -bound, bound)
        params.append((W, b))

    # small spec-sized case + a multi-tile case to exercise the grid/pipeline
    for (B, S) in [(2, 1), (4, 200)]:
        key, kx = jax.random.split(key)
        inp = jax.random.normal(kx, (B, S, no_input), jnp.float32)

        mu, sigma_chol = rnn_cell_forward(inp, params)
        jax.block_until_ready((mu, sigma_chol))

        assert mu.shape == (B, S, 2), mu.shape
        assert sigma_chol.shape == (B, 2 * S, 2), sigma_chol.shape

        mu_ref, sig_ref = _reference(inp, params)
        np.testing.assert_allclose(np.asarray(mu), np.asarray(mu_ref),
                                   rtol=1e-5, atol=1e-5)
        np.testing.assert_allclose(np.asarray(sigma_chol), np.asarray(sig_ref),
                                   rtol=1e-5, atol=1e-5)
        # diagonal of the Cholesky factor must be positive (softplus output)
        assert bool(jnp.all(sigma_chol[:, :S, 0] > 0))
        assert bool(jnp.all(sigma_chol[:, S:, 1] > 0))

    print("KERNEL_OK")
</pallas_src>

<mosaic_0001>
module attributes {stable_mosaic.version = 11 : i64} {
  func.func @_mlp_head_kernel(%arg0: i32, %arg1: memref<4x128xf32, #tpu.memory_space<vmem>>, %arg2: memref<32x4xf32, #tpu.memory_space<vmem>>, %arg3: memref<32x1xf32, #tpu.memory_space<vmem>>, %arg4: memref<32x32xf32, #tpu.memory_space<vmem>>, %arg5: memref<32x1xf32, #tpu.memory_space<vmem>>, %arg6: memref<8x32xf32, #tpu.memory_space<vmem>>, %arg7: memref<8x1xf32, #tpu.memory_space<vmem>>, %arg8: memref<8x128xf32, #tpu.memory_space<vmem>>) attributes {dimension_semantics = [#tpu.dimension_semantics<parallel>], iteration_bounds = array<i64: 1>, scalar_prefetch = 0 : i64, scratch_operands = 0 : i64, tpu.core_type = #tpu.core_type<tc>, window_params = [{transform_indices = @transform_0, window_bounds = array<i64: 4, 128>}, {pipeline_mode = #tpu.pipeline_mode<synchronous>, transform_indices = @transform_1, window_bounds = array<i64: 32, 4>}, {pipeline_mode = #tpu.pipeline_mode<synchronous>, transform_indices = @transform_2, window_bounds = array<i64: 32, 1>}, {pipeline_mode = #tpu.pipeline_mode<synchronous>, transform_indices = @transform_3, window_bounds = array<i64: 32, 32>}, {pipeline_mode = #tpu.pipeline_mode<synchronous>, transform_indices = @transform_4, window_bounds = array<i64: 32, 1>}, {pipeline_mode = #tpu.pipeline_mode<synchronous>, transform_indices = @transform_5, window_bounds = array<i64: 8, 32>}, {pipeline_mode = #tpu.pipeline_mode<synchronous>, transform_indices = @transform_6, window_bounds = array<i64: 8, 1>}, {transform_indices = @transform_7, window_bounds = array<i64: 8, 128>}]} {
    %c0 = arith.constant 0 : index
    %c0_0 = arith.constant 0 : index
    %0 = vector.load %arg1[%c0, %c0_0] : memref<4x128xf32, #tpu.memory_space<vmem>>, vector<4x128xf32>
    %c0_1 = arith.constant 0 : index
    %c0_2 = arith.constant 0 : index
    %1 = vector.load %arg2[%c0_1, %c0_2] : memref<32x4xf32, #tpu.memory_space<vmem>>, vector<32x4xf32>
    %c0_3 = arith.constant 0 : index
    %c0_4 = arith.constant 0 : index
    %2 = vector.load %arg3[%c0_3, %c0_4] : memref<32x1xf32, #tpu.memory_space<vmem>>, vector<32x1xf32>
    %cst = arith.constant dense<0.000000e+00> : vector<32x128xf32>
    %3 = tpu.matmul %1, %0, %cst {dimension_numbers = #tpu.dot_dimension_numbers<[1], [0], [0], [1], [0, 0, 1, 1], [], []>} : vector<32x4xf32>, vector<4x128xf32>, vector<32x128xf32> -> vector<32x128xf32>
    %4 = vector.broadcast %2 : vector<32x1xf32> to vector<32x128xf32>
    %5 = arith.addf %3, %4 : vector<32x128xf32>
    %cst_5 = arith.constant 0.000000e+00 : f32
    %6 = vector.broadcast %cst_5 : f32 to vector<32x128xf32>
    %7 = arith.maximumf %5, %6 : vector<32x128xf32>
    %c0_6 = arith.constant 0 : index
    %c0_7 = arith.constant 0 : index
    %8 = vector.load %arg4[%c0_6, %c0_7] : memref<32x32xf32, #tpu.memory_space<vmem>>, vector<32x32xf32>
    %c0_8 = arith.constant 0 : index
    %c0_9 = arith.constant 0 : index
    %9 = vector.load %arg5[%c0_8, %c0_9] : memref<32x1xf32, #tpu.memory_space<vmem>>, vector<32x1xf32>
    %cst_10 = arith.constant dense<0.000000e+00> : vector<32x128xf32>
    %10 = tpu.matmul %8, %7, %cst_10 {dimension_numbers = #tpu.dot_dimension_numbers<[1], [0], [0], [1], [0, 0, 1, 1], [], []>} : vector<32x32xf32>, vector<32x128xf32>, vector<32x128xf32> -> vector<32x128xf32>
    %11 = vector.broadcast %9 : vector<32x1xf32> to vector<32x128xf32>
    %12 = arith.addf %10, %11 : vector<32x128xf32>
    %cst_11 = arith.constant 0.000000e+00 : f32
    %13 = vector.broadcast %cst_11 : f32 to vector<32x128xf32>
    %14 = arith.maximumf %12, %13 : vector<32x128xf32>
    %c0_12 = arith.constant 0 : index
    %c0_13 = arith.constant 0 : index
    %15 = vector.load %arg6[%c0_12, %c0_13] : memref<8x32xf32, #tpu.memory_space<vmem>>, vector<8x32xf32>
    %c0_14 = arith.constant 0 : index
    %c0_15 = arith.constant 0 : index
    %16 = vector.load %arg7[%c0_14, %c0_15] : memref<8x1xf32, #tpu.memory_space<vmem>>, vector<8x1xf32>
    %cst_16 = arith.constant dense<0.000000e+00> : vector<8x128xf32>
    %17 = tpu.matmul %15, %14, %cst_16 {dimension_numbers = #tpu.dot_dimension_numbers<[1], [0], [0], [1], [0, 0, 1, 1], [], []>} : vector<8x32xf32>, vector<32x128xf32>, vector<8x128xf32> -> vector<8x128xf32>
    %18 = vector.broadcast %16 : vector<8x1xf32> to vector<8x128xf32>
    %19 = arith.addf %17, %18 : vector<8x128xf32>
    %20 = tpu.iota {dimensions = array<i32: 0>} : vector<8x128xi32>
    %c2_i32 = arith.constant 2 : i32
    %21 = vector.broadcast %c2_i32 : i32 to vector<8x128xi32>
    %22 = arith.cmpi eq, %20, %21 : vector<8x128xi32>
    %c5_i32 = arith.constant 5 : i32
    %23 = vector.broadcast %c5_i32 : i32 to vector<8x128xi32>
    %24 = arith.cmpi eq, %20, %23 : vector<8x128xi32>
    %25 = arith.ori %22, %24 : vector<8x128xi1>
    %cst_17 = arith.constant 2.000000e+01 : f32
    %26 = vector.broadcast %cst_17 : f32 to vector<8x128xf32>
    %27 = arith.cmpf ogt, %19, %26 : vector<8x128xf32>
    %cst_18 = arith.constant 2.000000e+01 : f32
    %28 = vector.broadcast %cst_18 : f32 to vector<8x128xf32>
    %29 = arith.minimumf %19, %28 : vector<8x128xf32>
    %30 = math.exp %29 : vector<8x128xf32>
    %31 = math.log1p %30 : vector<8x128xf32>
    %32 = arith.select %27, %19, %31 : vector<8x128xi1>, vector<8x128xf32>
    %33 = arith.select %25, %32, %19 : vector<8x128xi1>, vector<8x128xf32>
    %c0_19 = arith.constant 0 : index
    %c0_20 = arith.constant 0 : index
    %34 = vector.load %arg8[%c0_19, %c0_20] : memref<8x128xf32, #tpu.memory_space<vmem>>, vector<8x128xf32>
    tpu.vector_store %arg8[%c0_19, %c0_20], %33 {strides = array<i32>} : memref<8x128xf32, #tpu.memory_space<vmem>>, vector<8x128xf32>,
    return
  }
  func.func @transform_0(%arg0: i32) -> (i32, i32) {
    %c0_i32 = arith.constant 0 : i32
    %c0_i32_0 = arith.constant 0 : i32
    return %c0_i32, %arg0 : i32, i32
  }
  func.func @transform_1(%arg0: i32) -> (i32, i32) {
    %c0_i32 = arith.constant 0 : i32
    %c0_i32_0 = arith.constant 0 : i32
    %c0_i32_1 = arith.constant 0 : i32
    return %c0_i32, %c0_i32_0 : i32, i32
  }
  func.func @transform_2(%arg0: i32) -> (i32, i32) {
    %c0_i32 = arith.constant 0 : i32
    %c0_i32_0 = arith.constant 0 : i32
    %c0_i32_1 = arith.constant 0 : i32
    return %c0_i32, %c0_i32_0 : i32, i32
  }
  func.func @transform_3(%arg0: i32) -> (i32, i32) {
    %c0_i32 = arith.constant 0 : i32
    %c0_i32_0 = arith.constant 0 : i32
    %c0_i32_1 = arith.constant 0 : i32
    return %c0_i32, %c0_i32_0 : i32, i32
  }
  func.func @transform_4(%arg0: i32) -> (i32, i32) {
    %c0_i32 = arith.constant 0 : i32
    %c0_i32_0 = arith.constant 0 : i32
    %c0_i32_1 = arith.constant 0 : i32
    return %c0_i32, %c0_i32_0 : i32, i32
  }
  func.func @transform_5(%arg0: i32) -> (i32, i32) {
    %c0_i32 = arith.constant 0 : i32
    %c0_i32_0 = arith.constant 0 : i32
    %c0_i32_1 = arith.constant 0 : i32
    return %c0_i32, %c0_i32_0 : i32, i32
  }
  func.func @transform_6(%arg0: i32) -> (i32, i32) {
    %c0_i32 = arith.constant 0 : i32
    %c0_i32_0 = arith.constant 0 : i32
    %c0_i32_1 = arith.constant 0 : i32
    return %c0_i32, %c0_i32_0 : i32, i32
  }
  func.func @transform_7(%arg0: i32) -> (i32, i32) {
    %c0_i32 = arith.constant 0 : i32
    %c0_i32_0 = arith.constant 0 : i32
    return %c0_i32, %arg0 : i32, i32
  }
}

</mosaic_0001>

<bundles_post_ra>
// kernel: tpu_custom_call.1
= control target key start
LH: loop header
LB: loop body
LE: loop exit
PB: predicated region body
PF: predicated region fallthrough
CT: control target
= control target key end

     0   :  { %vm69_vm0 = vcmask 1043456   ;;  %vm56_vm1 = vcmask 31744   ;;  %v517_v5 = vmov 0   ;;  %s640_s0 = inlined_call_operand.vmem [shape: f32[4,128], index: 0, kind: input, shape index: {}]   ;;  %s641_s1 = inlined_call_operand.vmem [shape: f32[32,4], index: 1, kind: input, shape index: {}]   ;;  %s642_s2 = inlined_call_operand.vmem [shape: f32[32,1], index: 2, kind: input, shape index: {}]   ;;  %s643_s3 = inlined_call_operand.vmem [shape: f32[32,32], index: 3, kind: input, shape index: {}]   ;;  %s644_s4 = inlined_call_operand.vmem [shape: f32[32,1], index: 4, kind: input, shape index: {}]   ;;  %s645_s5 = inlined_call_operand.vmem [shape: f32[8,32], index: 5, kind: input, shape index: {}]   ;;  %s646_s6 = inlined_call_operand.vmem [shape: f32[8,1], index: 6, kind: input, shape index: {}]   ;;  %s647_s7 = inlined_call_operand.hbm [shape: f32[8,128], index: 7, kind: output, shape index: {}]  }
   0x1   :  { %v27_v0 = vld [vmem:[%s640_s0] sm:$0xf]  ;;  %v29_v2 = vld [vmem:[%s641_s1 + $0x8] sm:$0xff]  ;;  %v30_v3 = vld [vmem:[%s641_s1 + $0x10] sm:$0xff]  ;;  %487 = vset.pattern.permute.xlu0 %v517_v5  ;;  %488 = vset.pattern.permute.xlu1 %v517_v5 }
   0x2   :  { %v28_v1 = vld [vmem:[%s641_s1] sm:$0xff]  ;;  %435 = vmatprep.subr.msk.mxu0 %vm69_vm0, %v27_v0  ;;  %v34_v6 = vld [vmem:[%s642_s2 + $0x10] sm:$0xff]  ;;  %v31_v7 = vld [vmem:[%s641_s1 + $0x18] sm:$0xff] }
   0x3   :  { %437 = vmatprep.mubr.msk.f32.mxu0 %vm56_vm1, %v28_v1  ;;  %v32_v4 = vld [vmem:[%s642_s2] sm:$0xff]  ;;  %436 = vmatpush3.msk.msra.mxu0 %vm69_vm0, %v27_v0  ;;  %v33_v8 = vld [vmem:[%s642_s2 + $0x8] sm:$0xff] }
   0x4   :  { %438 = vmatmul.mubr.msk.f32.vlgmr.msra.gmra.mrb[0].mxu0 %vm56_vm1, %v29_v2  ;;  %38 = vperm.xlu0 %487, %v32_v4  }
   0x5   :  { %440 = vmatprep.mubr.msk.f32.mxu0 %vm56_vm1, %v30_v3 }
   0x6   :  { %12 = vsyncpa [#allocation3], 0  ;;  %48 = vperm.xlu1 %488, %v34_v6   ;;  %v35_v9 = vld [vmem:[%s642_s2 + $0x18] sm:$0xff]  ;;  %v166_v10 = vld [vmem:[%s644_s4] sm:$0xff]  ;;  %vm190_vm2 = vcmask 261120   ;;  %v518_v37 = vmov 0.0|0.0   ;;  %v372_v2 = vlaneseq }
   0x7   :  { %v167_v11 = vld [vmem:[%s644_s4 + $0x8] sm:$0xff]  ;;  %v168_v12 = vld [vmem:[%s644_s4 + $0x10] sm:$0xff]  ;;  %v169_v13 = vld [vmem:[%s644_s4 + $0x18] sm:$0xff]  ;;  %476 = vmatprep.subr.bf16.mxu0 %v518_v37  ;;  %vm519_vm3 = vmmov 0   ;;  %v520_v38 = vmov 0.0  }
   0x8   :  { %441 = vmatmul.mubr.msk.f32.gmra.mrb[2].mxu0 %vm56_vm1, %v31_v7  ;;  %43 = vperm.xlu0 %487, %v33_v8   ;;  %v293_v14 = vld [vmem:[%s646_s6] sm:$0xff]  ;;  %v163_v34 = vld [vmem:[%s643_s3 + $0x8] sm:$0xff]  ;;  %v164_v35 = vld [vmem:[%s643_s3 + $0x10] sm:$0xff]  ;;  %v373_v4 = vshrl.u32 %v372_v2, 7 }
   0x9   :  { %v162_v15 = vld [vmem:[%s643_s3] sm:$0xff]  ;;  %v165_v36 = vld [vmem:[%s643_s3 + $0x18] sm:$0xff]  ;;  %465 = vmatprep.mubr.msk.f32.mxu0 %vm519_vm3, %v520_v38 }
   0xa   :  { %53 = vperm.xlu1 %488, %v35_v9   ;;  %451 = vmatprep.mubr.msk.f32.mxu1 %vm190_vm2, %v162_v15  ;;  %v292_v57 = vld [vmem:[%s645_s5] sm:$0xff]  ;;  %vm374_vm4 = vcmp.eq.s32.totalorder %v373_v4, 2  ;;  %vm375_vm5 = vcmp.eq.s32.totalorder %v373_v4, 5  ;;  %s521_s5 = smov [#allocation2]  }
   0xb   :  { %s399_s10 = sshll.u32 %s521_s5, 4  ;;  %vm376_vm6 = vmor %vm374_vm4, %vm375_vm5  ;;  %s400_s10 = int_to_ptr.vmem [resolvable:$true] %s399_s10 }
   0xc   :  { %172 = vperm.xlu0 %487, %v166_v10   ;;  %s493_s0 = scalar_lea.vmem %s400_s10, 128  ;;  %p498_p1 = scmp.lt.s32.totalorder %s400_s10, %s400_s10 }
   0xd   :  { %p494_p0 = scmp.ne.s32.totalorder %s400_s10, %s493_s0  ;;  %p499_p2 = scmp.lt.s32.totalorder %s493_s0, %s493_s0 }
   0xe   :  { %177 = vperm.xlu1 %488, %v167_v11  }
   0xf   :  { %p500_p3 = por %p499_p2, %p498_p1 }
  0x10   :  { %182 = vperm.xlu0 %487, %v168_v12  }
  0x11   :  { %p501_p4 = pnand %p500_p3, %p494_p0 }
  0x12   :  { %187 = vperm.xlu1 %488, %v169_v13  }
  0x14   :  { %296 = vperm.xlu0 %487, %v293_v14  }
  0x83   :  { %v39_v16 = vpop.permute.xlu0 %38 }
  0x85   :  { %v49_v17 = vpop.permute.xlu1 %48 }
  0x87   :  { %v44_v18 = vpop.permute.xlu0 %43 }
  0x89   :  { %v54_v24 = vpop.permute.xlu1 %53 }
  0x8b   :  { %v173_v40 = vpop.permute.xlu0 %172 }
  0x8d   :  { %v178_v39 = vpop.permute.xlu1 %177 }
  0x8f   :  { %v183_v49 = vpop.permute.xlu0 %182 }
  0x91   :  { %v188_v46 = vpop.permute.xlu1 %187 }
  0x93   :  { %v297_v58 = vpop.permute.xlu0 %296 }
  0xd7   :  { %v439_v19 = vpop.f32.mrb[0].mxu0 }
  0xd8   :  { %v145_v20 = vadd.f32 %v439_v19, %v44_v18  ;;  %v139_v21 = vpop.f32.mrb[1].mxu0 }
  0xd9   :  { %v140_v22 = vadd.f32 %v139_v21, %v39_v16 }
  0xda   :  { %v159_v23 = vmax.f32 %v145_v20, 0.0 }
  0xdb   :  { %v158_v25 = vmax.f32 %v140_v22, 0.0  ;;  %v442_v26 = vpop.f32.mrb[2].mxu0 }
  0xdc   :  { %v155_v27 = vadd.f32 %v442_v26, %v54_v24  ;;  %v149_v28 = vpop.f32.mrb[3].mxu0 }
  0xdd   :  { %v150_v29 = vadd.f32 %v149_v28, %v49_v17  ;;  %v468_v30 = vpack.c.bf16 %v159_v23, %v158_v25 }
  0xde   :  { %v161_v31 = vmax.f32 %v155_v27, 0.0 }
  0xdf   :  { %v160_v32 = vmax.f32 %v150_v29, 0.0  ;;  %469 = vmatprep.subr.bf16.mxu1 %v468_v30 }
  0xe0   :  { %471 = vmatpush3.bf16.msra.mxu1 %v468_v30 }
  0xe1   :  { %v472_v33 = vpack.c.bf16 %v161_v31, %v160_v32 }
  0xe3   :  { %473 = vmatprep.subr.bf16.mxu1 %v472_v33 }
  0xe4   :  { %475 = vmatpush3.bf16.msra.mxu1 %v472_v33 }
  0xe7   :  { %452 = vmatmul.mubr.msk.f32.vlgmr.msra.gmra.mrb[0].mxu1 %vm190_vm2, %v163_v34 }
  0xe8   :  { %454 = vmatprep.mubr.msk.f32.mxu1 %vm190_vm2, %v164_v35 }
  0xeb   :  { %455 = vmatmul.mubr.msk.f32.gmra.mrb[2].mxu1 %vm190_vm2, %v165_v36 }
 0x1ba   :  { %v453_v41 = vpop.f32.mrb[0].mxu1 }
 0x1bb   :  { %v275_v42 = vadd.f32 %v453_v41, %v178_v39  ;;  %v269_v43 = vpop.f32.mrb[1].mxu1 }
 0x1bc   :  { %v270_v44 = vadd.f32 %v269_v43, %v173_v40 }
 0x1bd   :  { %v289_v45 = vmax.f32 %v275_v42, 0.0 }
 0x1be   :  { %v288_v47 = vmax.f32 %v270_v44, 0.0  ;;  %v456_v48 = vpop.f32.mrb[2].mxu1 }
 0x1bf   :  { %v285_v50 = vadd.f32 %v456_v48, %v188_v46  ;;  %v279_v51 = vpop.f32.mrb[3].mxu1 }
 0x1c0   :  { %v477_v52 = vpack.c.bf16 %v289_v45, %v288_v47  ;;  %v280_v53 = vadd.f32 %v279_v51, %v183_v49 }
 0x1c1   :  { %v291_v54 = vmax.f32 %v285_v50, 0.0 }
 0x1c2   :  { %v290_v55 = vmax.f32 %v280_v53, 0.0  ;;  %478 = vmatpush3.bf16.msra.mxu0 %v477_v52 }
 0x1c3   :  { %479 = vmatprep.subr.bf16.mxu0 %v518_v37 }
 0x1c4   :  { %v480_v56 = vpack.c.bf16 %v291_v54, %v290_v55 }
 0x1c6   :  { %481 = vmatpush3.bf16.msra.mxu0 %v480_v56 }
 0x1c9   :  { %466 = vmatmul.mubr.msk.f32.vlgmr.msra.gmra.mrb[4].mxu0 %vm190_vm2, %v292_v57 }
 0x29c   :  { %v368_v59 = vpop.f32.mrb[4].mxu0 }
 0x29d   :  { %v369_v60 = vadd.f32 %v368_v59, %v297_v58  ;;  %v467_v61 = vpop.f32.mrb[5].mxu0 }
 0x29f   :  { %v378_v62 = vmin.f32 %v369_v60, 20.0  ;;  %vm377_vm8 = vcmp.gt.f32.partialorder %v369_v60, 20.0 }
 0x2a1   :  { %v379_v63 = vmul.f32 1.442695, %v378_v62 }
 0x2a3   :  { %489 = vpow2.f32 %v379_v63 }
 0x2ad   :  { %v490_v0 = vpop.eup %489 }
 0x2ae   :  { %v381_v1 = vadd.f32 1.0, %v490_v0  ;;  %v384_v3 = vmul.f32 -0.5, %v490_v0  ;;  %v387_v6 = vand.u32 2147483647, %v490_v0 }
 0x2b0   :  { %491 = vlog2.f32 %v381_v1  ;;  %v385_v5 = vadd.f32 1.0, %v384_v3  ;;  %vm388_vm7 = vcmp.lt.f32.partialorder %v387_v6, 0.0004427343 }
 0x2b2   :  { %v386_v9 = vmul.f32 %v490_v0, %v385_v5 }
 0x2ba   :  { %v492_v7 = vpop.eup %491 }
 0x2bb   :  { %v383_v8 = vmul.f32 0.6931472, %v492_v7 }
 0x2bd   :  { %v389_v10 = vsel %vm388_vm7, %v386_v9, %v383_v8 }
 0x2be   :  { %v390_v11 = vsel %vm377_vm8, %v369_v60, %v389_v10 }
 0x2bf   :  { %v391_v12 = vsel %vm376_vm6, %v390_v11, %v369_v60 }
 0x2c0   :  { %392 = vst [vmem:[#allocation2] sm:$0xff] %v391_v12 }
 0x2c1   :  { %504 = shalt.err (!%p501_p4)
}
 0x2c2   :  { %s505_s13 = scalar_lea.hbm %s647_s7, 128 }
 0x2c3   :  { %p506_p5 = scmp.ne.s32.totalorder %s647_s7, %s505_s13  ;;  %p509_p6 = scmp.lt.u32.totalorder %s505_s13, %s647_s7 }
 0x2c5   :  { %p511_p7 = pnand %p509_p6, %p506_p5 }
 0x2c7   :  { %514 = shalt.err (!%p511_p7)
}
 0x2c8   :  { %402 = dma.vmem_to_hbm [thread:$0]  %s400_s10, 128, %s647_s7, [#allocation3]  }
 0x2c9   :  { %515 = dma.done.wait [#allocation3], 128  }
 0x2ca   :  { %516 = vsyncadd [#allocation3], 4294967168 }
 0x2cb   :  { %406 = vsyncpa [#allocation3], 1 }

</bundles_post_ra>
